<compile_context>
chip_gen: v5e
topology: v5e:2x2
jax: 0.10.0
libtpu: 0.0.40
codegen_flags: <defaults>
</compile_context>

<pallas_src>
import functools

import jax
import jax.numpy as jnp
from jax.experimental import pallas as pl
from jax.experimental.pallas import tpu as pltpu


def _pow_static(base, gamma):
    """(base)**gamma for base >= 0 with a static Python-float gamma."""
    g = float(gamma)
    if g.is_integer() and 0.0 <= g <= 8.0:
        return base ** int(g)                 # lax.integer_pow -> cheap VPU muls
    return jnp.exp(g * jnp.log(base))         # general case via EUP exp/log


def _focal_loss_kernel(x_ref, t_ref, w_ref, out_ref, *,
                       alpha, gamma, n_rows, block_rows):
    i = pl.program_id(0)

    @pl.when(i == 0)
    def _init():
        out_ref[...] = jnp.zeros_like(out_ref)

    x = x_ref[...].astype(jnp.float32)        # (BN, C) logits
    t = t_ref[...]                            # (BN, 1) int32 class indices
    cw = w_ref[...].astype(jnp.float32)       # (1,  C) per-class weights

    bn, c = x.shape
    class_ids = jax.lax.broadcasted_iota(jnp.int32, (bn, c), 1)
    onehot = (class_ids == t).astype(jnp.float32)               # (BN, C)

    # stable log-softmax evaluated only at the target class
    m = jnp.max(x, axis=-1, keepdims=True)                      # (BN, 1)
    lse = m + jnp.log(jnp.sum(jnp.exp(x - m), axis=-1, keepdims=True))
    x_t = jnp.sum(x * onehot, axis=-1, keepdims=True)           # (BN, 1)
    logp = x_t - lse                                            # log p_t
    p = jnp.exp(logp)                                           # p_t

    loss = -alpha * _pow_static(1.0 - p, gamma) * logp          # (BN, 1)
    w_t = jnp.sum(cw * onehot, axis=-1, keepdims=True)          # weight[targets]
    loss = loss * w_t

    # mask rows past the true batch size (partial last tile)
    row_ids = i * block_rows + jax.lax.broadcasted_iota(jnp.int32, (bn, 1), 0)
    loss = jnp.where(row_ids < n_rows, loss, 0.0)

    out_ref[...] += jnp.sum(loss, axis=(0, 1), keepdims=True)   # (1, 1)

    @pl.when(i == pl.num_programs(0) - 1)
    def _finalize():
        out_ref[...] = out_ref[...] * (1.0 / n_rows)            # mean()


def weighted_focal_loss(inputs, targets, alpha, gamma, weight=None,
                        block_rows=256):
    """inputs: (N, C) f32 logits, targets: (N,) int class ids,
    weight: optional (C,) per-class weights. Returns scalar mean focal loss."""
    n, c = inputs.shape
    if weight is None:
        weight = jnp.ones((c,), dtype=jnp.float32)
    weight2d = weight.reshape(1, c).astype(jnp.float32)
    targets2d = targets.reshape(n, 1).astype(jnp.int32)

    bn = min(int(block_rows), n)
    if bn < n:                       # keep sublane-aligned row tiles
        bn = max(8, (bn // 8) * 8)
    grid = (pl.cdiv(n, bn),)

    kernel = functools.partial(
        _focal_loss_kernel,
        alpha=float(alpha), gamma=float(gamma), n_rows=n, block_rows=bn)

    out = pl.pallas_call(
        kernel,
        out_shape=jax.ShapeDtypeStruct((1, 1), jnp.float32),
        grid_spec=pltpu.PrefetchScalarGridSpec(
            num_scalar_prefetch=0,
            grid=grid,
            in_specs=[
                pl.BlockSpec((bn, c), lambda i: (i, 0)),   # logits row tile
                pl.BlockSpec((bn, 1), lambda i: (i, 0)),   # targets row tile
                pl.BlockSpec((1, c), lambda i: (0, 0)),    # class weights (resident)
            ],
            out_specs=pl.BlockSpec((1, 1), lambda i: (0, 0)),   # scalar accumulator
        ),
        compiler_params=pltpu.CompilerParams(
            dimension_semantics=("arbitrary",),   # sequential reduction into out
        ),
    )(inputs.astype(jnp.float32), targets2d, weight2d)

    return out[0, 0]


def _reference(inputs, targets, alpha, gamma, weight=None):
    # pure-JAX mirror of the PyTorch forward
    sm = jax.nn.softmax(inputs, axis=1)
    p_t = jnp.take_along_axis(sm, targets[:, None], axis=1)     # (N, 1)
    loss = -alpha * (1.0 - p_t) ** gamma * jnp.log(p_t)
    if weight is not None:
        loss = loss * weight[targets][:, None]
    return jnp.mean(loss)


if __name__ == "__main__":
    N, C = 128, 10                   # batch of logits over 10 classes
    alpha, gamma = 0.25, 2.0

    key = jax.random.PRNGKey(0)
    k_x, k_t, k_w = jax.random.split(key, 3)
    inputs = jax.random.normal(k_x, (N, C), dtype=jnp.float32)
    targets = jax.random.randint(k_t, (N,), 0, C, dtype=jnp.int32)
    class_weight = jax.random.uniform(k_w, (C,), dtype=jnp.float32,
                                      minval=0.5, maxval=1.5)

    # weighted path (self.weight is not None)
    loss = weighted_focal_loss(inputs, targets, alpha, gamma, class_weight,
                               block_rows=64)
    loss = jax.block_until_ready(loss)
    ref = _reference(inputs, targets, alpha, gamma, class_weight)
    assert loss.shape == (), loss.shape
    assert jnp.allclose(loss, ref, atol=1e-5, rtol=1e-5), (float(loss), float(ref))

    # unweighted path (self.weight is None)
    loss_nw = jax.block_until_ready(
        weighted_focal_loss(inputs, targets, alpha, gamma, None, block_rows=64))
    ref_nw = _reference(inputs, targets, alpha, gamma, None)
    assert jnp.allclose(loss_nw, ref_nw, atol=1e-5, rtol=1e-5), (
        float(loss_nw), float(ref_nw))

    print("KERNEL_OK")
</pallas_src>

<mosaic_0001>
module attributes {stable_mosaic.version = 11 : i64} {
  func.func @_focal_loss_kernel(%arg0: i32, %arg1: memref<64x10xf32, #tpu.memory_space<vmem>>, %arg2: memref<64x1xi32, #tpu.memory_space<vmem>>, %arg3: memref<1x10xf32, #tpu.memory_space<vmem>>, %arg4: memref<1x1xf32, #tpu.memory_space<vmem>>) attributes {dimension_semantics = [#tpu.dimension_semantics<arbitrary>], iteration_bounds = array<i64: 2>, scalar_prefetch = 0 : i64, scratch_operands = 0 : i64, tpu.core_type = #tpu.core_type<tc>, window_params = [{transform_indices = @transform_0, window_bounds = array<i64: 64, 10>}, {transform_indices = @transform_1, window_bounds = array<i64: 64, 1>}, {pipeline_mode = #tpu.pipeline_mode<synchronous>, transform_indices = @transform_2, window_bounds = array<i64: 1, 10>}, {pipeline_mode = #tpu.pipeline_mode<synchronous>, transform_indices = @transform_3, window_bounds = array<i64: 1, 1>}]} {
    %c0_i32 = arith.constant 0 : i32
    %0 = arith.cmpi eq, %arg0, %c0_i32 : i32
    %1 = arith.extui %0 : i1 to i32
    %c0_i32_0 = arith.constant 0 : i32
    %2 = arith.cmpi ne, %1, %c0_i32_0 : i32
    scf.if %2 {
      %cst_18 = arith.constant 0.000000e+00 : f32
      %55 = vector.broadcast %cst_18 : f32 to vector<1x1xf32>
      %c0_19 = arith.constant 0 : index
      %c0_20 = arith.constant 0 : index
      %56 = vector.load %arg4[%c0_19, %c0_20] : memref<1x1xf32, #tpu.memory_space<vmem>>, vector<1x1xf32>
      tpu.vector_store %arg4[%c0_19, %c0_20], %55 {strides = array<i32>} : memref<1x1xf32, #tpu.memory_space<vmem>>, vector<1x1xf32>,
    } else {
    }
    %c0 = arith.constant 0 : index
    %c0_1 = arith.constant 0 : index
    %3 = vector.load %arg1[%c0, %c0_1] : memref<64x10xf32, #tpu.memory_space<vmem>>, vector<64x10xf32>
    %c0_2 = arith.constant 0 : index
    %c0_3 = arith.constant 0 : index
    %4 = vector.load %arg2[%c0_2, %c0_3] : memref<64x1xi32, #tpu.memory_space<vmem>>, vector<64x1xi32>
    %c0_4 = arith.constant 0 : index
    %c0_5 = arith.constant 0 : index
    %5 = vector.load %arg3[%c0_4, %c0_5] : memref<1x10xf32, #tpu.memory_space<vmem>>, vector<1x10xf32>
    %6 = tpu.iota {dimensions = array<i32: 1>} : vector<64x10xi32>
    %7 = vector.broadcast %4 : vector<64x1xi32> to vector<64x10xi32>
    %8 = arith.cmpi eq, %6, %7 : vector<64x10xi32>
    %9 = arith.extui %8 : vector<64x10xi1> to vector<64x10xi32>
    %10 = arith.sitofp %9 : vector<64x10xi32> to vector<64x10xf32>
    %cst = arith.constant dense<0xFF800000> : vector<64xf32>
    %11 = vector.multi_reduction <maximumf>, %3, %cst [1] : vector<64x10xf32> to vector<64xf32>
    %12 = vector.shape_cast %11 : vector<64xf32> to vector<64x1xf32>
    %13 = vector.broadcast %12 : vector<64x1xf32> to vector<64x10xf32>
    %14 = arith.subf %3, %13 : vector<64x10xf32>
    %15 = math.exp %14 : vector<64x10xf32>
    %cst_6 = arith.constant dense<0.000000e+00> : vector<64xf32>
    %16 = vector.multi_reduction <add>, %15, %cst_6 [1] : vector<64x10xf32> to vector<64xf32>
    %17 = vector.shape_cast %16 : vector<64xf32> to vector<64x1xf32>
    %18 = math.log %17 : vector<64x1xf32>
    %19 = arith.addf %12, %18 : vector<64x1xf32>
    %20 = arith.mulf %3, %10 : vector<64x10xf32>
    %cst_7 = arith.constant dense<0.000000e+00> : vector<64xf32>
    %21 = vector.multi_reduction <add>, %20, %cst_7 [1] : vector<64x10xf32> to vector<64xf32>
    %22 = vector.shape_cast %21 : vector<64xf32> to vector<64x1xf32>
    %23 = arith.subf %22, %19 : vector<64x1xf32>
    %24 = math.exp %23 : vector<64x1xf32>
    %cst_8 = arith.constant 1.000000e+00 : f32
    %25 = vector.broadcast %cst_8 : f32 to vector<64x1xf32>
    %26 = arith.subf %25, %24 : vector<64x1xf32>
    %27 = arith.mulf %26, %26 : vector<64x1xf32>
    %cst_9 = arith.constant -2.500000e-01 : f32
    %28 = vector.broadcast %cst_9 : f32 to vector<64x1xf32>
    %29 = arith.mulf %28, %27 : vector<64x1xf32>
    %30 = arith.mulf %29, %23 : vector<64x1xf32>
    %31 = vector.broadcast %5 : vector<1x10xf32> to vector<64x10xf32>
    %32 = arith.mulf %31, %10 : vector<64x10xf32>
    %cst_10 = arith.constant dense<0.000000e+00> : vector<64xf32>
    %33 = vector.multi_reduction <add>, %32, %cst_10 [1] : vector<64x10xf32> to vector<64xf32>
    %34 = vector.shape_cast %33 : vector<64xf32> to vector<64x1xf32>
    %35 = arith.mulf %30, %34 : vector<64x1xf32>
    %c64_i32 = arith.constant 64 : i32
    %36 = arith.muli %arg0, %c64_i32 : i32
    %37 = tpu.iota {dimensions = array<i32: 0>} : vector<64x1xi32>
    %38 = vector.broadcast %36 : i32 to vector<64x1xi32>
    %39 = arith.addi %38, %37 : vector<64x1xi32>
    %c128_i32 = arith.constant 128 : i32
    %40 = vector.broadcast %c128_i32 : i32 to vector<64x1xi32>
    %41 = arith.cmpi slt, %39, %40 : vector<64x1xi32>
    %cst_11 = arith.constant 0.000000e+00 : f32
    %42 = vector.broadcast %cst_11 : f32 to vector<64x1xf32>
    %43 = arith.select %41, %35, %42 : vector<64x1xi1>, vector<64x1xf32>
    %c0_12 = arith.constant 0 : index
    %c0_13 = arith.constant 0 : index
    %44 = vector.load %arg4[%c0_12, %c0_13] : memref<1x1xf32, #tpu.memory_space<vmem>>, vector<1x1xf32>
    %45 = vector.shape_cast %43 : vector<64x1xf32> to vector<1x64x1xf32>
    %cst_14 = arith.constant dense<0.000000e+00> : vector<1xf32>
    %46 = vector.multi_reduction <add>, %45, %cst_14 [1, 2] : vector<1x64x1xf32> to vector<1xf32>
    %47 = vector.shape_cast %46 : vector<1xf32> to vector<1x1x1xf32>
    %48 = vector.extract %47[0, 0, 0] : f32 from vector<1x1x1xf32>
    %49 = vector.broadcast %48 : f32 to vector<1x1xf32>
    %50 = arith.addf %44, %49 : vector<1x1xf32>
    %c0_15 = arith.constant 0 : index
    %c0_16 = arith.constant 0 : index
    %51 = vector.load %arg4[%c0_15, %c0_16] : memref<1x1xf32, #tpu.memory_space<vmem>>, vector<1x1xf32>
    tpu.vector_store %arg4[%c0_15, %c0_16], %50 {strides = array<i32>} : memref<1x1xf32, #tpu.memory_space<vmem>>, vector<1x1xf32>,
    %c1_i32 = arith.constant 1 : i32
    %52 = arith.cmpi eq, %arg0, %c1_i32 : i32
    %53 = arith.extui %52 : i1 to i32
    %c0_i32_17 = arith.constant 0 : i32
    %54 = arith.cmpi ne, %53, %c0_i32_17 : i32
    scf.if %54 {
      %c0_18 = arith.constant 0 : index
      %c0_19 = arith.constant 0 : index
      %55 = vector.load %arg4[%c0_18, %c0_19] : memref<1x1xf32, #tpu.memory_space<vmem>>, vector<1x1xf32>
      %cst_20 = arith.constant 7.812500e-03 : f32
      %56 = vector.broadcast %cst_20 : f32 to vector<1x1xf32>
      %57 = arith.mulf %55, %56 : vector<1x1xf32>
      %c0_21 = arith.constant 0 : index
      %c0_22 = arith.constant 0 : index
      %58 = vector.load %arg4[%c0_21, %c0_22] : memref<1x1xf32, #tpu.memory_space<vmem>>, vector<1x1xf32>
      tpu.vector_store %arg4[%c0_21, %c0_22], %57 {strides = array<i32>} : memref<1x1xf32, #tpu.memory_space<vmem>>, vector<1x1xf32>,
    } else {
    }
    return
  }
  func.func @transform_0(%arg0: i32) -> (i32, i32) {
    %c0_i32 = arith.constant 0 : i32
    %c0_i32_0 = arith.constant 0 : i32
    return %arg0, %c0_i32 : i32, i32
  }
  func.func @transform_1(%arg0: i32) -> (i32, i32) {
    %c0_i32 = arith.constant 0 : i32
    %c0_i32_0 = arith.constant 0 : i32
    return %arg0, %c0_i32 : i32, i32
  }
  func.func @transform_2(%arg0: i32) -> (i32, i32) {
    %c0_i32 = arith.constant 0 : i32
    %c0_i32_0 = arith.constant 0 : i32
    %c0_i32_1 = arith.constant 0 : i32
    return %c0_i32, %c0_i32_0 : i32, i32
  }
  func.func @transform_3(%arg0: i32) -> (i32, i32) {
    %c0_i32 = arith.constant 0 : i32
    %c0_i32_0 = arith.constant 0 : i32
    %c0_i32_1 = arith.constant 0 : i32
    return %c0_i32, %c0_i32_0 : i32, i32
  }
}

</mosaic_0001>

<bundles_post_ra>
// kernel: tpu_custom_call.1
= control target key start
LH: loop header
LB: loop body
LE: loop exit
PB: predicated region body
PF: predicated region fallthrough
CT: control target
= control target key end

     0   :  { %8 = vsyncpa [#allocation3], 0  ;;  %s773_s12 = smov 0   ;;  %s1014_s0 = inlined_call_operand.vmem [shape: f32[128,10], index: 0, kind: input, shape index: {}]   ;;  %s1015_s1 = inlined_call_operand.vmem [shape: s32[128,1], index: 1, kind: input, shape index: {}]   ;;  %s1016_s2 = inlined_call_operand.vmem [shape: f32[1,10], index: 2, kind: input, shape index: {}]   ;;  %s1017_s3 = inlined_call_operand.hbm [shape: f32[1,1], index: 3, kind: output, shape index: {}]  }
   0x1 LB: > { %s779_s13 = sadd.s32 4294967295, %s747_s12   ;;  %p617_p0 = scmp.ge.s32.totalorder %s747_s12, 1  ;;  %s747_s12 = sphi %s773_s12, %s14_s12  }
   0x2   : > { %p145_p1 = scmp.lt.s32.totalorder %s747_s12, 3 }
   0x4   : > { %p146_p2 = pnand %p617_p0, %p145_p1 }
   0x5   : > { %s618_s14 = sshll.u32 (!%p146_p2), %s779_s13, 3  ;;  %p622_p4 = scmp.ne.s32.totalorder (!%p146_p2), %s779_s13, 0 }
   0x6   : > { %149 = sbr.rel (%p146_p2) target bundleno = 552 (0x228), region = 32  ;;  %p170_p3 = scmp.lt.s32.totalorder (!%p146_p2), %s618_s14, 15 }
   0xb   : > { %s1019_s14 = smov (!%p170_p3, %s618_s14), 15  ;;  %184 = sbr.rel (%p622_p4) target bundleno = 18 (0x12), region = 36 }
   0xc   : > { %s619_s15 = sshll.u32 %s1019_s14, 3 }
   0xd   : > { %s787_s18 = scalar_lea.vmem %s1014_s0, %s619_s15  ;;  %s792_s21 = scalar_lea.vmem %s1015_s1, %s619_s15 }
  0x10   : > { %vm185_vm0 = vcmask 0   ;;  %v749_v0 = vmov 0.0  }
  0x11   : > { %186 = vst.msk [vmem:[#allocation2] sm:$0x1] %vm185_vm0, %v749_v0 }
  0x12 PF: > { %v796_v1 = vld [vmem:[%s787_s18 + $0x20] sm:$0xff]  ;;  %vm254_vm1 = vcmask 80896   ;;  %v799_v2 = vld [vmem:[%s787_s18 + $0x10] sm:$0xff]  ;;  %v750_v7 = vmov 0   ;;  %v811_v8 = vld [vmem:[%s787_s18 + $0x28] sm:$0xff]  ;;  %v204_v32 = vlaneseq  ;;  %v751_v42 = vmov 0.0  }
  0x13   : > { %v802_v3 = vld [vmem:[%s787_s18] sm:$0xff]  ;;  %v267_v4 = vsel %vm254_vm1, %v796_v1, -inf  ;;  %v261_v5 = vsel %vm254_vm1, %v799_v2, -inf  ;;  %657 = vset.pattern.permute.xlu2 %v750_v7  ;;  %658 = vset.pattern.permute.xlu0 %v750_v7  ;;  %v814_v9 = vld [vmem:[%s787_s18 + $0x18] sm:$0xff]  ;;  %v817_v10 = vld [vmem:[%s787_s18 + $0x8] sm:$0xff]  ;;  %v270_v11 = vsel %vm254_vm1, %v811_v8, -inf }
  0x14   : > { %v255_v6 = vsel %vm254_vm1, %v802_v3, -inf  ;;  %268 = vmax.xlane.f32.xlu2 %v267_v4  ;;  %262 = vmax.xlane.f32.xlu1 %v261_v5  ;;  %v264_v12 = vsel %vm254_vm1, %v814_v9, -inf  ;;  %v258_v13 = vsel %vm254_vm1, %v817_v10, -inf  ;;  %v826_v14 = vld [vmem:[%s787_s18 + $0x38] sm:$0xff]  ;;  %v829_v15 = vld [vmem:[%s787_s18 + $0x30] sm:$0xff]  ;;  %v195_v18 = vld [vmem:[%s792_s21] sm:$0xff] }
  0x15   : > { %256 = vmax.xlane.f32.xlu0 %v255_v6  ;;  %659 = vset.pattern.permute.xlu1 %v750_v7  ;;  %v276_v16 = vsel %vm254_vm1, %v826_v14, -inf  ;;  %v273_v17 = vsel %vm254_vm1, %v829_v15, -inf  ;;  %v196_v19 = vld [vmem:[%s792_s21 + $0x8] sm:$0xff]  ;;  %v198_v20 = vld [vmem:[%s792_s21 + $0x18] sm:$0xff]  ;;  %v197_v21 = vld [vmem:[%s792_s21 + $0x10] sm:$0xff]  ;;  %v862_v37 = vand.u32 127, %v204_v32 }
  0x16   : > { %v199_v22 = vld [vmem:[%s792_s21 + $0x20] sm:$0xff]  ;;  %v200_v23 = vld [vmem:[%s792_s21 + $0x28] sm:$0xff]  ;;  %v201_v24 = vld [vmem:[%s792_s21 + $0x30] sm:$0xff]  ;;  %s631_s24 = sshll.u32 %s779_s13, 6  ;;  %vm518_vm11 = vcmask 7168   ;;  %p632_p5 = scmp.ne.s32.totalorder %s779_s13, 1 }
  0x17   : > { %v202_v25 = vld [vmem:[%s792_s21 + $0x38] sm:$0xff] }
  0x1c   : > { %271 = vmax.xlane.f32.xlu2 %v270_v11  ;;  %265 = vmax.xlane.f32.xlu1 %v264_v12 }
  0x1d   : > { %259 = vmax.xlane.f32.xlu0 %v258_v13 }
  0x24   : > { %277 = vmax.xlane.f32.xlu1 %v276_v16 }
  0x25   : > { %274 = vmax.xlane.f32.xlu0 %v273_v17 }
  0x34   : > { %207 = vperm.xlu2 %657, %v195_v18  }
  0x39   : > { %210 = vperm.xlu0 %658, %v196_v19  }
  0x3c   : > { %216 = vperm.xlu2 %657, %v198_v20  }
  0x3d   : > { %213 = vperm.xlu1 %659, %v197_v21  }
  0x44   : > { %219 = vperm.xlu2 %657, %v199_v22  }
  0x45   : > { %222 = vperm.xlu1 %659, %v200_v23  }
  0x4c   : > { %225 = vperm.xlu2 %657, %v201_v24  }
  0x4d   : > { %228 = vperm.xlu1 %659, %v202_v25  }
  0x87   : > { %v843_v26 = vpop.xlane.xlu2 %268  ;;  %v845_v27 = vpop.xlane.xlu1 %262 }
  0x88   : > { %v847_v28 = vpop.xlane.xlu0 %256  ;;  %v283_v44 = vsub.f32 %v796_v1, %v843_v26  ;;  %v281_v60 = vsub.f32 %v799_v2, %v845_v27 }
  0x89   : > { %v279_v35 = vsub.f32 %v802_v3, %v847_v28 }
  0x8a   : > { %v295_v50 = vmul.f32 1.442695, %v283_v44  ;;  %v291_v63 = vmul.f32 1.442695, %v281_v60 }
  0x8b   : > { %v287_v39 = vmul.f32 1.442695, %v279_v35 }
  0x8f   : > { %v849_v29 = vpop.xlane.xlu2 %271  ;;  %v851_v30 = vpop.xlane.xlu1 %265 }
  0x90   : > { %v853_v31 = vpop.xlane.xlu0 %259  ;;  %v282_v34 = vsub.f32 %v814_v9, %v851_v30  ;;  %v284_v11 = vsub.f32 %v811_v8, %v849_v29 }
  0x91   : > { %v280_v33 = vsub.f32 %v817_v10, %v853_v31 }
  0x92   : > { %v293_v38 = vmul.f32 1.442695, %v282_v34  ;;  %v297_v19 = vmul.f32 1.442695, %v284_v11 }
  0x93   : > { %v289_v36 = vmul.f32 1.442695, %v280_v33 }
  0x95   : > { %661 = vpow2.f32 %v289_v36  ;;  %v660_v36 = vld [vmem:[%s1016_s2] ss:$0 sm:$0xff] }
  0x96   : > { %663 = vpow2.f32 %v293_v38 }
  0x97   : > { %v208_v40 = vpop.permute.xlu2 %207  ;;  %665 = vpow2.f32 %v287_v39  ;;  %v878_v51 = vpop.xlane.xlu1 %277 }
  0x98   : > { %vm230_vm2 = vcmp.eq.s32.totalorder %v862_v37, %v208_v40  ;;  %v865_v41 = vpop.xlane.xlu0 %274  ;;  %v286_v55 = vsub.f32 %v826_v14, %v878_v51  ;;  %667 = vpow2.f32 %v295_v50 }
  0x99   : > { %v868_v43 = vsel %vm230_vm2, 1.0, %v751_v42  ;;  %v285_v47 = vsub.f32 %v829_v15, %v865_v41 }
  0x9a   : > { %v351_v45 = vmul.f32 %v868_v43, %v802_v3  ;;  %v301_v59 = vmul.f32 1.442695, %v286_v55 }
  0x9b   : > { %v662_v46 = vpop.eup %661  ;;  %v299_v53 = vmul.f32 1.442695, %v285_v47 }
  0x9c   : > { %v306_v48 = vsel %vm254_vm1, %v662_v46, 0.0  ;;  %v359_v49 = vsel %vm254_vm1, %v351_v45, 0.0  ;;  %v664_v52 = vpop.eup %663 }
  0x9d   : > { %307 = vadd.xlane.f32.xlu2 %v306_v48  ;;  %360 = vadd.xlane.f32.xlu0 %v359_v49  ;;  %v666_v54 = vpop.eup %665  ;;  %v312_v56 = vsel %vm254_vm1, %v664_v52, 0.0  ;;  %669 = vpow2.f32 %v299_v53 }
  0x9e   : > { %v303_v57 = vsel %vm254_vm1, %v666_v54, 0.0  ;;  %v668_v61 = vpop.eup %667  ;;  %671 = vpow2.f32 %v301_v59 }
  0x9f   : > { %v217_v58 = vpop.permute.xlu2 %216  ;;  %v315_v4 = vsel %vm254_vm1, %v668_v61, 0.0  ;;  %673 = vpow2.f32 %v291_v63 }
  0xa0   : > { %675 = vpow2.f32 %v297_v19  ;;  %vm233_vm7 = vcmp.eq.s32.totalorder %v862_v37, %v217_v58 }
  0xa1   : > { %v626_v40 = vsel %vm233_vm7, 1.0, %v751_v42 }
  0xa2   : > { %v354_v49 = vmul.f32 %v626_v40, %v814_v9  ;;  %v445_v50 = vmul.f32 %v660_v36, %v626_v40 }
  0xa3   : > { %v670_v62 = vpop.eup %669 }
  0xa4   : > { %v321_v3 = vsel %vm254_vm1, %v670_v62, 0.0  ;;  %v672_v7 = vpop.eup %671 }
  0xa5   : > { %313 = vadd.xlane.f32.xlu2 %v312_v56  ;;  %304 = vadd.xlane.f32.xlu0 %v303_v57  ;;  %v324_v18 = vsel %vm254_vm1, %v672_v7, 0.0  ;;  %v674_v21 = vpop.eup %673 }
  0xa6   : > { %v309_v24 = vsel %vm254_vm1, %v674_v21, 0.0  ;;  %v676_v38 = vpop.eup %675 }
  0xa7   : > { %v220_v12 = vpop.permute.xlu2 %219 }
  0xa8   : > { %vm234_vm5 = vcmp.eq.s32.totalorder %v862_v37, %v220_v12 }
  0xa9   : > { %v627_v22 = vsel %vm234_vm5, 1.0, %v751_v42 }
  0xaa   : > { %v355_v25 = vmul.f32 %v627_v22, %v796_v1  ;;  %v318_v1 = vsel %vm254_vm1, %v676_v38, 0.0  ;;  %v446_v60 = vmul.f32 %v660_v36, %v627_v22 }
  0xab   : > { %v211_v0 = vpop.permute.xlu0 %210 }
  0xac   : > { %vm231_vm3 = vcmp.eq.s32.totalorder %v862_v37, %v211_v0  ;;  %v371_v34 = vsel %vm254_vm1, %v355_v25, 0.0 }
  0xad   : > { %v890_v5 = vsel %vm231_vm3, 1.0, %v751_v42  ;;  %322 = vadd.xlane.f32.xlu2 %v321_v3  ;;  %316 = vadd.xlane.f32.xlu0 %v315_v4  ;;  %vm545_vm3 = vcmask 0  }
  0xae   : > { %v352_v6 = vmul.f32 %v890_v5, %v817_v10 }
  0xaf   : > { %v214_v13 = vpop.permute.xlu1 %213  ;;  %v226_v46 = vpop.permute.xlu2 %225 }
  0xb0   : > { %vm232_vm4 = vcmp.eq.s32.totalorder %v862_v37, %v214_v13  ;;  %v362_v16 = vsel %vm254_vm1, %v352_v6, 0.0  ;;  %vm236_vm9 = vcmp.eq.s32.totalorder %v862_v37, %v226_v46 }
  0xb1   : > { %v625_v17 = vsel %vm232_vm4, 1.0, %v751_v42  ;;  %363 = vadd.xlane.f32.xlu1 %v362_v16  ;;  %v629_v53 = vsel %vm236_vm9, 1.0, %v751_v42 }
  0xb2   : > { %v353_v10 = vmul.f32 %v625_v17, %v799_v2  ;;  %v444_v52 = vmul.f32 %v660_v36, %v625_v17  ;;  %v357_v55 = vmul.f32 %v629_v53, %v829_v15  ;;  %v448_v56 = vmul.f32 %v660_v36, %v629_v53 }
  0xb3   : > { %v462_v15 = vsel %vm254_vm1, %v446_v60, 0.0 }
  0xb4   : > { %v365_v20 = vsel %vm254_vm1, %v353_v10, 0.0  ;;  %v456_v54 = vsel %vm254_vm1, %v444_v52, 0.0  ;;  %v377_v9 = vsel %vm254_vm1, %v357_v55, 0.0 }
  0xb5   : > { %325 = vadd.xlane.f32.xlu2 %v324_v18  ;;  %366 = vadd.xlane.f32.xlu0 %v365_v20 }
  0xb7   : > { %v223_v23 = vpop.permute.xlu1 %222 }
  0xb8   : > { %vm235_vm6 = vcmp.eq.s32.totalorder %v862_v37, %v223_v23 }
  0xb9   : > { %v628_v33 = vsel %vm235_vm6, 1.0, %v751_v42  ;;  %310 = vadd.xlane.f32.xlu1 %v309_v24 }
  0xba   : > { %v356_v2 = vmul.f32 %v628_v33, %v811_v8  ;;  %v442_v8 = vmul.f32 %v660_v36, %v868_v43  ;;  %v368_v43 = vsel %vm254_vm1, %v354_v49, 0.0  ;;  %v447_v57 = vmul.f32 %v660_v36, %v628_v33 }
  0xbc   : > { %v374_v35 = vsel %vm254_vm1, %v356_v2, 0.0  ;;  %v450_v47 = vsel %vm254_vm1, %v442_v8, 0.0  ;;  %v465_v58 = vsel %vm254_vm1, %v447_v57, 0.0 }
  0xbd   : > { %372 = vadd.xlane.f32.xlu2 %v371_v34  ;;  %375 = vadd.xlane.f32.xlu0 %v374_v35 }
  0xbf   : > { %v229_v39 = vpop.permute.xlu1 %228 }
  0xc0   : > { %vm237_vm8 = vcmp.eq.s32.totalorder %v862_v37, %v229_v39  ;;  %v468_v37 = vsel %vm254_vm1, %v448_v56, 0.0 }
  0xc1   : > { %v630_v44 = vsel %vm237_vm8, 1.0, %v751_v42  ;;  %319 = vadd.xlane.f32.xlu1 %v318_v1  ;;  %v443_v42 = vmul.f32 %v660_v36, %v890_v5 }
  0xc2   : > { %v358_v45 = vmul.f32 %v630_v44, %v826_v14  ;;  %v459_v14 = vsel %vm254_vm1, %v445_v50, 0.0  ;;  %v449_v61 = vmul.f32 %v660_v36, %v630_v44 }
  0xc3   : > { %v453_v59 = vsel %vm254_vm1, %v443_v42, 0.0 }
  0xc4   : > { %v380_v48 = vsel %vm254_vm1, %v358_v45, 0.0  ;;  %v471_v62 = vsel %vm254_vm1, %v449_v61, 0.0 }
  0xc5   : > { %451 = vadd.xlane.f32.xlu0 %v450_v47  ;;  %381 = vadd.xlane.f32.xlu2 %v380_v48 }
  0xc9   : > { %369 = vadd.xlane.f32.xlu1 %v368_v43 }
  0xcd   : > { %460 = vadd.xlane.f32.xlu0 %v459_v14  ;;  %457 = vadd.xlane.f32.xlu2 %v456_v54 }
  0xd1   : > { %378 = vadd.xlane.f32.xlu1 %v377_v9 }
  0xd5   : > { %469 = vadd.xlane.f32.xlu0 %v468_v37  ;;  %466 = vadd.xlane.f32.xlu2 %v465_v58 }
  0xd9   : > { %454 = vadd.xlane.f32.xlu1 %v453_v59  ;;  %v962_v59 = vstv %s631_s24 }
  0xe1   : > { %463 = vadd.xlane.f32.xlu1 %v462_v15 }
  0xe9   : > { %472 = vadd.xlane.f32.xlu1 %v471_v62 }
 0x110   : > { %v308_v63 = vpop.xlane.xlu2 %307  ;;  %v361_v0 = vpop.xlane.xlu0 %360 }
 0x118   : > { %v314_v3 = vpop.xlane.xlu2 %313  ;;  %v305_v4 = vpop.xlane.xlu0 %304 }
 0x119   : > { %677 = vlog2.f32 %v305_v4 }
 0x11a   : > { %679 = vlog2.f32 %v308_v63 }
 0x11f   : > { %v678_v5 = vpop.eup %677 }
 0x120   : > { %v323_v6 = vpop.xlane.xlu2 %322  ;;  %v328_v7 = vmul.f32 0.6931472, %v678_v5  ;;  %v680_v11 = vpop.eup %679 }
 0x121   : > { %v317_v13 = vpop.xlane.xlu0 %316  ;;  %v330_v17 = vmul.f32 0.6931472, %v680_v11 }
 0x122   : > { %v343_v12 = vadd.f32 %v328_v7, %v847_v28  ;;  %681 = vlog2.f32 %v317_v13 }
 0x123   : > { %v344_v19 = vadd.f32 %v330_v17, %v853_v31 }
 0x124   : > { %v364_v16 = vpop.xlane.xlu1 %363  ;;  %v938_v10 = vsub.f32 %v361_v0, %v343_v12 }
 0x125   : > { %v942_v23 = vsub.f32 %v364_v16, %v344_v19 }
 0x126   : > { %v391_v21 = vmul.f32 1.442695, %v938_v10 }
 0x127   : > { %v393_v25 = vmul.f32 1.442695, %v942_v23 }
 0x128   : > { %v326_v18 = vpop.xlane.xlu2 %325  ;;  %v682_v22 = vpop.eup %681 }
 0x129   : > { %v367_v24 = vpop.xlane.xlu0 %366  ;;  %v336_v28 = vmul.f32 0.6931472, %v682_v22 }
 0x12b   : > { %v347_v31 = vadd.f32 %v336_v28, %v843_v26 }
 0x12c   : > { %v311_v20 = vpop.xlane.xlu1 %310 }
 0x12d   : > { %683 = vlog2.f32 %v311_v20 }
 0x12e   : > { %685 = vlog2.f32 %v314_v3 }
 0x12f   : > { %687 = vlog2.f32 %v326_v18 }
 0x130   : > { %689 = vpow2.f32 %v391_v21  ;;  %v373_v33 = vpop.xlane.xlu2 %372 }
 0x131   : > { %691 = vlog2.f32 %v323_v6  ;;  %v947_v8 = vsub.f32 %v373_v33, %v347_v31  ;;  %v376_v46 = vpop.xlane.xlu0 %375 }
 0x132   : > { %693 = vpow2.f32 %v393_v25 }
 0x133   : > { %v684_v2 = vpop.eup %683  ;;  %v399_v49 = vmul.f32 1.442695, %v947_v8 }
 0x134   : > { %v686_v34 = vpop.eup %685  ;;  %v332_v35 = vmul.f32 0.6931472, %v684_v2  ;;  %v320_v36 = vpop.xlane.xlu1 %319 }
 0x135   : > { %v688_v38 = vpop.eup %687  ;;  %695 = vlog2.f32 %v320_v36  ;;  %v334_v40 = vmul.f32 0.6931472, %v686_v34 }
 0x136   : > { %v690_v39 = vpop.eup %689  ;;  %v345_v1 = vadd.f32 %v332_v35, %v845_v27  ;;  %v342_v44 = vmul.f32 0.6931472, %v688_v38 }
 0x137   : > { %v407_v47 = vsub.f32 1.0, %v690_v39  ;;  %v692_v48 = vpop.eup %691  ;;  %v346_v52 = vadd.f32 %v334_v40, %v851_v30  ;;  %v960_v30 = vshrl.u32 %v204_v32, 7 }
 0x138   : > { %v385_v45 = vsub.f32 %v367_v24, %v345_v1  ;;  %v694_v26 = vpop.eup %693  ;;  %v382_v50 = vpop.xlane.xlu2 %381  ;;  %v350_v27 = vadd.f32 %v342_v44, %v878_v51  ;;  %v340_v37 = vmul.f32 0.6931472, %v692_v48 }
 0x139   : > { %v415_v55 = vmul.f32 %v407_v47, %v407_v47  ;;  %v408_v56 = vsub.f32 1.0, %v694_v26  ;;  %v452_v63 = vpop.xlane.xlu0 %451  ;;  %v493_v32 = vadd.s32 %v962_v59, %v960_v30  ;;  %v486_v5 = vadd.s32 16, %v960_v30 }
 0x13a   : > { %v395_v43 = vmul.f32 1.442695, %v385_v45  ;;  %v954_v57 = vsub.f32 %v382_v50, %v350_v27  ;;  %v349_v3 = vadd.f32 %v340_v37, %v865_v41  ;;  %v487_v6 = vadd.s32 24, %v960_v30 }
 0x13b   : > { %v696_v53 = vpop.eup %695  ;;  %v423_v51 = vmul.f32 -0.25, %v415_v55  ;;  %v416_v62 = vmul.f32 %v408_v56, %v408_v56  ;;  %v485_v11 = vadd.s32 8, %v960_v30  ;;  %vm501_vm10 = vcmp.lt.s32.totalorder %v493_v32, 128 }
 0x13c   : > { %v370_v14 = vpop.xlane.xlu1 %369  ;;  %697 = vpow2.f32 %v395_v43  ;;  %v338_v54 = vmul.f32 0.6931472, %v696_v53  ;;  %v405_v61 = vmul.f32 1.442695, %v954_v57  ;;  %v495_v24 = vadd.s32 %v962_v59, %v486_v5 }
 0x13d   : > { %v952_v9 = vsub.f32 %v370_v14, %v346_v52  ;;  %699 = vpow2.f32 %v399_v49  ;;  %v431_v12 = vmul.f32 %v423_v51, %v938_v10  ;;  %v424_v41 = vmul.f32 -0.25, %v416_v62 }
 0x13e   : > { %v348_v58 = vadd.f32 %v338_v54, %v849_v29  ;;  %v494_v28 = vadd.s32 %v962_v59, %v485_v11  ;;  %v496_v33 = vadd.s32 %v962_v59, %v487_v6  ;;  %v489_v2 = vadd.s32 40, %v960_v30 }
 0x13f   : > { %v397_v42 = vmul.f32 1.442695, %v952_v9  ;;  %v474_v19 = vmul.f32 %v452_v63, %v431_v12  ;;  %v488_v35 = vadd.s32 32, %v960_v30  ;;  %v432_v39 = vmul.f32 %v424_v41, %v942_v23 }
 0x140   : > { %v964_v60 = vsub.f32 %v376_v46, %v348_v58  ;;  %v458_v25 = vpop.xlane.xlu2 %457  ;;  %vm503_vm12 = vcmp.lt.s32.totalorder %v495_v24, 128  ;;  %vm502_vm13 = vcmp.lt.s32.totalorder %v494_v28, 128  ;;  %vm504_vm14 = vcmp.lt.s32.totalorder %v496_v33, 128 }
 0x141   : > { %701 = vpow2.f32 %v397_v42  ;;  %v509_v36 = vsel %vm501_vm10, %v474_v19, 0.0  ;;  %v461_v47 = vpop.xlane.xlu0 %460  ;;  %v498_v48 = vadd.s32 %v962_v59, %v489_v2  ;;  %v490_v49 = vadd.s32 48, %v960_v30 }
 0x142   : > { %v698_v15 = vpop.eup %697  ;;  %v401_v29 = vmul.f32 1.442695, %v964_v60  ;;  %v519_v26 = vsel %vm518_vm11, %v509_v36, 0.0  ;;  %v497_v23 = vadd.s32 %v962_v59, %v488_v35  ;;  %v491_v11 = vadd.s32 56, %v960_v30 }
 0x143   : > { %v409_v0 = vsub.f32 1.0, %v698_v15  ;;  %v700_v4 = vpop.eup %699  ;;  %vm506_vm15 = vcmp.lt.s32.totalorder %v498_v48, 128  ;;  %v499_v51 = vadd.s32 %v962_v59, %v490_v49 }
 0x144   : > { %v379_v7 = vpop.xlane.xlu1 %378  ;;  %703 = vpow2.f32 %v401_v29  ;;  %v411_v18 = vsub.f32 1.0, %v700_v4  ;;  %vm505_vm0 = vcmp.lt.s32.totalorder %v497_v23, 128 }
 0x145   : > { %v417_v13 = vmul.f32 %v409_v0, %v409_v0  ;;  %v975_v16 = vsub.f32 %v379_v7, %v349_v3  ;;  %705 = vpow2.f32 %v405_v61  ;;  %vm507_vm1 = vcmp.lt.s32.totalorder %v499_v51, 128 }
 0x146   : > { %v419_v1 = vmul.f32 %v411_v18, %v411_v18 }
 0x147   : > { %v702_v17 = vpop.eup %701  ;;  %v425_v20 = vmul.f32 -0.25, %v417_v13  ;;  %v403_v21 = vmul.f32 1.442695, %v975_v16 }
 0x148   : > { %v410_v22 = vsub.f32 1.0, %v702_v17  ;;  %v427_v55 = vmul.f32 -0.25, %v419_v1  ;;  %v467_v0 = vpop.xlane.xlu2 %466 }
 0x149   : > { %v433_v10 = vmul.f32 %v425_v20, %v385_v45  ;;  %707 = vpow2.f32 %v403_v21  ;;  %v470_v41 = vpop.xlane.xlu0 %469  ;;  %v500_v21 = vadd.s32 %v962_v59, %v491_v11 }
 0x14a   : > { %v418_v34 = vmul.f32 %v410_v22, %v410_v22  ;;  %v704_v31 = vpop.eup %703  ;;  %v435_v29 = vmul.f32 %v427_v55, %v947_v8 }
 0x14b   : > { %v476_v38 = vmul.f32 %v458_v25, %v433_v10  ;;  %v706_v40 = vpop.eup %705  ;;  %v412_v46 = vsub.f32 1.0, %v704_v31  ;;  %vm508_vm2 = vcmp.lt.s32.totalorder %v500_v21, 128 }
 0x14c   : > { %v426_v44 = vmul.f32 -0.25, %v418_v34  ;;  %v455_v45 = vpop.xlane.xlu1 %454  ;;  %v414_v27 = vsub.f32 1.0, %v706_v40 }
 0x14d   : > { %v475_v43 = vmul.f32 %v455_v45, %v432_v39  ;;  %v420_v52 = vmul.f32 %v412_v46, %v412_v46  ;;  %v511_v14 = vsel %vm503_vm12, %v476_v38, 0.0 }
 0x14e   : > { %v434_v50 = vmul.f32 %v426_v44, %v952_v9  ;;  %v522_v9 = vsel %vm518_vm11, %v511_v14, 0.0  ;;  %v422_v4 = vmul.f32 %v414_v27, %v414_v27 }
 0x14f   : > { %v708_v53 = vpop.eup %707  ;;  %v510_v54 = vsel %vm502_vm13, %v475_v43, 0.0  ;;  %v428_v58 = vmul.f32 -0.25, %v420_v52 }
 0x150   : > { %v477_v56 = vmul.f32 %v461_v47, %v434_v50  ;;  %v413_v37 = vsub.f32 1.0, %v708_v53  ;;  %v520_v42 = vsel %vm518_vm11, %v510_v54, 0.0  ;;  %v430_v19 = vmul.f32 -0.25, %v422_v4 }
 0x151   : > { %v521_v15 = vadd.f32 %v520_v42, %v519_v26  ;;  %v436_v62 = vmul.f32 %v428_v58, %v964_v60 }
 0x152   : > { %v512_v61 = vsel %vm504_vm14, %v477_v56, 0.0  ;;  %v421_v63 = vmul.f32 %v413_v37, %v413_v37  ;;  %v438_v30 = vmul.f32 %v430_v19, %v954_v57  ;;  %v517_v57 = vld [vmem:[#allocation2] sm:$0x1] }
 0x153   : > { %v523_v3 = vadd.f32 %v522_v9, %v521_v15  ;;  %v524_v32 = vsel %vm518_vm11, %v512_v61, 0.0  ;;  %v479_v5 = vmul.f32 %v467_v0, %v436_v62 }
 0x154   : > { %v429_v6 = vmul.f32 -0.25, %v421_v63  ;;  %v464_v7 = vpop.xlane.xlu1 %463 }
 0x155   : > { %v478_v12 = vmul.f32 %v464_v7, %v435_v29  ;;  %v514_v60 = vsel %vm506_vm15, %v479_v5, 0.0  ;;  %v525_v18 = vadd.f32 %v524_v32, %v523_v3 }
 0x156   : > { %v437_v13 = vmul.f32 %v429_v6, %v975_v16  ;;  %v528_v24 = vsel %vm518_vm11, %v514_v60, 0.0 }
 0x157   : > { %v513_v17 = vsel %vm505_vm0, %v478_v12, 0.0 }
 0x158   : > { %v480_v20 = vmul.f32 %v470_v41, %v437_v13  ;;  %v526_v8 = vsel %vm518_vm11, %v513_v17, 0.0 }
 0x159   : > { %v527_v22 = vadd.f32 %v526_v8, %v525_v18 }
 0x15a   : > { %v515_v28 = vsel %vm507_vm1, %v480_v20, 0.0 }
 0x15b   : > { %v529_v25 = vadd.f32 %v528_v24, %v527_v22  ;;  %v530_v16 = vsel %vm518_vm11, %v515_v28, 0.0 }
 0x15c   : > { %v473_v10 = vpop.xlane.xlu1 %472 }
 0x15d   : > { %v481_v33 = vmul.f32 %v473_v10, %v438_v30  ;;  %v531_v34 = vadd.f32 %v530_v16, %v529_v25 }
 0x15f   : > { %v516_v2 = vsel %vm508_vm2, %v481_v33, 0.0 }
 0x160   : > { %v532_v35 = vsel %vm518_vm11, %v516_v2, 0.0 }
 0x161   : > { %v533_v31 = vadd.f32 %v532_v35, %v531_v34 }
 0x163   : > { %534 = vadd.xlane.f32.xlu2 %v533_v31 }
 0x1d6   : > { %v535_v36 = vpop.xlane.xlu2 %534 }
 0x1d7   : > { %v536_v59 = vrot.slane %v535_v36, 4 }
 0x1d9   : > { %v537_v38 = vadd.f32 %v536_v59, %v535_v36 }
 0x1db   : > { %v538_v39 = vrot.slane %v537_v38, 2 }
 0x1dd   : > { %v539_v1 = vadd.f32 %v538_v39, %v537_v38 }
 0x1df   : > { %v540_v40 = vrot.slane %v539_v1, 1 }
 0x1e1   : > { %v541_v44 = vadd.f32 %v540_v40, %v539_v1 }
 0x1e3   : > { %637 = vpush %v541_v44 }
 0x214   : > { %s638_s25 = spop %637  ;;  %550 = sbr.rel (%p632_p5) target bundleno = 547 (0x223), region = 40 }
 0x215   : > { %v543_v46 = vstv %s638_s25 }
 0x216   : > { %v544_v45 = vadd.f32 %v543_v46, %v517_v57 }
 0x218   : > { %546 = vst.msk [vmem:[#allocation2] sm:$0x1] %vm545_vm3, %v544_v45 }
 0x21f   : > { %v551_v47 = vld [vmem:[#allocation2] sm:$0x1] }
 0x220   : > { %v552_v48 = vmul.f32 0.0078125, %v551_v47 }
 0x222   : > { %553 = vst.msk [vmem:[#allocation2] sm:$0x1] %vm545_vm3, %v552_v48 }
 0x223 PF: > { %p643_p6 = scmp.eq.s32.totalorder %s779_s13, 1  ;;  %s752_s26 = smov [#allocation2]  }
 0x224   : > { %s560_s27 = sshll.u32 %s752_s26, 4  ;;  %s562_s30 = sshll.u32 %s1017_s3, 4  ;;  %s561_s27 = int_to_ptr.vmem [resolvable:$true] %s560_s27  ;;  %s563_s30 = int_to_ptr.hbm [resolvable:$true] %s562_s30 }
 0x225   : > { %640 = dma.vmem_to_hbm [thread:$0]  (%p643_p6), %s561_s27, 16, %s563_s30, [#allocation3]  }
 0x226   : > { %742 = dma.done.wait (%p643_p6), [#allocation3], 16  }
 0x227   : > { %744 = vsyncadd (%p643_p6), [#allocation3], 4294967280 }
 0x228 PF: > { %s14_s12 = sadd.s32 1, %s747_s12  }
 0x229   : > { %p11_p7 = scmp.ge.s32.totalorder %s14_s12, 4  }
 0x22b   :  { %13 = sbr.rel (!%p11_p7) target bundleno = 1 (0x1), region = 70 }
 0x230   :  { %576 = vsyncpa [#allocation3], 1 }
 0x231   :  { %578 = vsyncpa [#allocation3 + $0x1], 1 }

</bundles_post_ra>
